<compile_context>
chip_gen: v7x
topology: tpu7x:2x2x1
jax: 0.10.0
libtpu: 0.0.40
codegen_flags: <defaults>
</compile_context>

<pallas_src>
import jax
import jax.numpy as jnp
from jax.experimental import pallas as pl
from jax.experimental.pallas import tpu as pltpu

_LANE = 128
_SUBLANE = 8
_MIN_TILE = _LANE * _SUBLANE       # 1024 samples -> (8, 256) / (8, 128) blocks
_TILE_BUDGET = 512 * 1024          # samples / grid step: 6 MB payload,
                                   # ~12.5 MB double-buffered (fits 32 MiB
                                   # scoped VMEM on v5e / v6e / v7x)


def _round_up(x, m):
    return ((x + m - 1) // m) * m


def _linear_kernel(b_ref, x_ref, a_ref, o_ref):
    # b_ref: SMEM (1,)        bias scalar
    # x_ref: VMEM (TR, 256)   128 samples per row, features interleaved
    # a_ref: VMEM (256, 128)  constant de-interleave weight matrix (resident)
    # o_ref: VMEM (TR, 128)   y for the same 128*TR samples, row-major
    o_ref[...] = (
        jnp.dot(x_ref[...], a_ref[...], preferred_element_type=jnp.float32)
        + b_ref[0]
    )


def shallow_net_forward(x, weight, bias):
    """Pallas equivalent of ShallowNet.forward.

    x:      (N, 2) float32
    weight: (1, 2) float32  (PyTorch nn.Linear convention: (out, in))
    bias:   (1,)   float32
    returns (N, 1) float32
    """
    n, in_f = x.shape
    out_f = weight.shape[0]
    assert in_f == 2 and out_f == 1, "ShallowNet is Linear(2, 1)"

    x = x.astype(jnp.float32)
    weight = weight.astype(jnp.float32)
    bias = bias.astype(jnp.float32)

    # Tile selection: aim for >= 4 grid steps (pipelining + v7x dual-TC
    # sharding of the "parallel" axis) without exceeding the VMEM budget.
    tn = _round_up(max(pl.cdiv(n, 4), 1), _MIN_TILE)
    tn = min(tn, _TILE_BUDGET)
    n_pad = _round_up(n, tn)
    grid = (n_pad // tn,)
    tr = tn // _LANE                       # block sublane rows (multiple of 8)

    # Pad only when strictly needed; then reinterpret row-major (N_pad, 2) as
    # (N_pad/128, 256) -- a free view, no transpose/relayout in HBM.
    if n_pad != n:
        x = jnp.pad(x, ((0, n_pad - n), (0, 0)))
    x2 = x.reshape(n_pad // _LANE, 2 * _LANE)

    # De-interleave weight matrix: A[2j + f, j] = weight[0, f].
    a_mat = jnp.kron(jnp.eye(_LANE, dtype=jnp.float32), weight.reshape(2, 1))

    y2 = pl.pallas_call(
        _linear_kernel,
        out_shape=jax.ShapeDtypeStruct((n_pad // _LANE, _LANE), jnp.float32),
        grid=grid,
        in_specs=[
            pl.BlockSpec(memory_space=pltpu.MemorySpace.SMEM),       # bias
            pl.BlockSpec((tr, 2 * _LANE), lambda i: (i, 0)),         # x view
            pl.BlockSpec((2 * _LANE, _LANE), lambda i: (0, 0)),      # A (resident)
        ],
        out_specs=pl.BlockSpec((tr, _LANE), lambda i: (i, 0)),
        compiler_params=pltpu.CompilerParams(
            dimension_semantics=("parallel",),
            vmem_limit_bytes=32 * 1024 * 1024,
        ),
    )(bias, x2, a_mat)

    # (N_pad/128, 128) -> (N_pad, 1) is a pure row-major view.
    y = y2.reshape(n_pad, out_f)
    if n_pad != n:
        y = y[:n]
    return y


if __name__ == "__main__":
    key = jax.random.PRNGKey(0)
    k_w, k_b, k_x, k_x2 = jax.random.split(key, 4)

    # Deterministic parameter init (shapes from nn.Linear(2, 1, bias=True)).
    bound = 1.0 / jnp.sqrt(2.0)
    weight = jax.random.uniform(k_w, (1, 2), jnp.float32, -bound, bound)
    bias = jax.random.uniform(k_b, (1,), jnp.float32, -bound, bound)

    # Small input consistent with forward: (batch, in_features) = (4, 2).
    # (The script's constant X is (2, 4); Linear(2, 1) implies last dim = 2.)
    x = jax.random.normal(k_x, (4, 2), jnp.float32)
    out = jax.block_until_ready(shallow_net_forward(x, weight, bias))
    ref = x @ weight.T + bias
    assert out.shape == (4, 1)
    assert jnp.allclose(out, ref, atol=1e-4, rtol=1e-4)

    # Larger run exercising a multi-step "parallel" grid (grid = (4,)),
    # no padding, free input/output views.
    x_big = jax.random.normal(k_x2, (4096, 2), jnp.float32)
    out_big = jax.block_until_ready(shallow_net_forward(x_big, weight, bias))
    ref_big = x_big @ weight.T + bias
    assert out_big.shape == (4096, 1)
    assert jnp.allclose(out_big, ref_big, atol=1e-4, rtol=1e-4)

    print("KERNEL_OK")
</pallas_src>

<mosaic_0001>
module attributes {stable_mosaic.version = 11 : i64} {
  func.func @_linear_kernel(%arg0: i32, %arg1: memref<1xf32, #tpu.memory_space<smem>>, %arg2: memref<8x256xf32, #tpu.memory_space<vmem>>, %arg3: memref<256x128xf32, #tpu.memory_space<vmem>>, %arg4: memref<8x128xf32, #tpu.memory_space<vmem>>) attributes {dimension_semantics = [#tpu.dimension_semantics<parallel>], iteration_bounds = array<i64: 1>, scalar_prefetch = 0 : i64, scratch_operands = 0 : i64, tpu.core_type = #tpu.core_type<tc>, window_params = [{transform_indices = @transform_0, window_bounds = array<i64: 1>}, {transform_indices = @transform_1, window_bounds = array<i64: 8, 256>}, {pipeline_mode = #tpu.pipeline_mode<synchronous>, transform_indices = @transform_2, window_bounds = array<i64: 256, 128>}, {transform_indices = @transform_3, window_bounds = array<i64: 8, 128>}]} {
    %c0 = arith.constant 0 : index
    %c0_0 = arith.constant 0 : index
    %0 = vector.load %arg2[%c0, %c0_0] : memref<8x256xf32, #tpu.memory_space<vmem>>, vector<8x256xf32>
    %c0_1 = arith.constant 0 : index
    %c0_2 = arith.constant 0 : index
    %1 = vector.load %arg3[%c0_1, %c0_2] : memref<256x128xf32, #tpu.memory_space<vmem>>, vector<256x128xf32>
    %cst = arith.constant dense<0.000000e+00> : vector<8x128xf32>
    %2 = tpu.matmul %0, %1, %cst {dimension_numbers = #tpu.dot_dimension_numbers<[1], [0], [0], [1], [0, 0, 1, 1], [], []>} : vector<8x256xf32>, vector<256x128xf32>, vector<8x128xf32> -> vector<8x128xf32>
    %c0_3 = arith.constant 0 : index
    %3 = memref.load %arg1[%c0_3] : memref<1xf32, #tpu.memory_space<smem>>
    %4 = vector.broadcast %3 : f32 to vector<8x128xf32>
    %5 = arith.addf %2, %4 : vector<8x128xf32>
    %c0_4 = arith.constant 0 : index
    %c0_5 = arith.constant 0 : index
    %6 = vector.load %arg4[%c0_4, %c0_5] : memref<8x128xf32, #tpu.memory_space<vmem>>, vector<8x128xf32>
    tpu.vector_store %arg4[%c0_4, %c0_5], %5 {strides = array<i32>} : memref<8x128xf32, #tpu.memory_space<vmem>>, vector<8x128xf32>,
    return
  }
  func.func @transform_0(%arg0: i32) -> i32 {
    %c0_i32 = arith.constant 0 : i32
    %c0_i32_0 = arith.constant 0 : i32
    return %c0_i32 : i32
  }
  func.func @transform_1(%arg0: i32) -> (i32, i32) {
    %c0_i32 = arith.constant 0 : i32
    %c0_i32_0 = arith.constant 0 : i32
    return %arg0, %c0_i32 : i32, i32
  }
  func.func @transform_2(%arg0: i32) -> (i32, i32) {
    %c0_i32 = arith.constant 0 : i32
    %c0_i32_0 = arith.constant 0 : i32
    %c0_i32_1 = arith.constant 0 : i32
    return %c0_i32, %c0_i32_0 : i32, i32
  }
  func.func @transform_3(%arg0: i32) -> (i32, i32) {
    %c0_i32 = arith.constant 0 : i32
    %c0_i32_0 = arith.constant 0 : i32
    return %arg0, %c0_i32 : i32, i32
  }
}

</mosaic_0001>

<bundles_post_ra>
// kernel: tpu_custom_call.1
= control target key start
LH: loop header
LB: loop body
LE: loop exit
PB: predicated region body
PF: predicated region fallthrough
CT: control target
= control target key end

     0   :  { %9 = vsyncpa [#allocation4], 0  ;;  %s380_s0 = inlined_call_operand.<no memory space> [shape: f32[1], index: 0, kind: input, shape index: {}]   ;;  %s381_s1 = inlined_call_operand.hbm [shape: f32[8,256], index: 1, kind: input, shape index: {}]   ;;  %s382_s2 = inlined_call_operand.hbm [shape: f32[256,128], index: 2, kind: input, shape index: {}]   ;;  %s383_s3 = inlined_call_operand.hbm [shape: f32[8,128], index: 3, kind: output, shape index: {}]  }
   0x1   :  { %10 = vsyncpa [#allocation7], 0 }
   0x2   :  { %11 = vsyncpa [#allocation5], 0  ;;  %s309_s12 = smov [#allocation3]   ;;  %s310_s14 = smov [#allocation6]  }
   0x3   :  { %s20_s13 = sshll.u32 %s309_s12, 4  ;;  %s29_s15 = sshll.u32 %s310_s14, 4  ;;  %s21_s13 = int_to_ptr.vmem [resolvable:$true] %s20_s13  ;;  %s334_s15 = int_to_ptr.vmem [resolvable:$true] %s29_s15 }
   0x4   :  { %s237_s18 = scalar_lea.hbm %s381_s1, 256 }
   0x5   :  { %p238_p0 = scmp.ne.s32.totalorder %s381_s1, %s237_s18  ;;  %p241_p1 = scmp.lt.u32.totalorder %s237_s18, %s381_s1 }
   0x7   :  { %p243_p2 = pnand %p241_p1, %p238_p0 }
   0x9   :  { %246 = shalt.err (!%p243_p2)
}
   0xa   :  { %s247_s23 = scalar_lea.vmem %s21_s13, 256  ;;  %p252_p4 = scmp.lt.s32.totalorder %s21_s13, %s21_s13 }
   0xb   :  { %p248_p3 = scmp.ne.s32.totalorder %s21_s13, %s247_s23  ;;  %p253_p5 = scmp.lt.s32.totalorder %s247_s23, %s247_s23 }
   0xd   :  { %p254_p6 = por %p253_p5, %p252_p4 }
   0xf   :  { %p255_p7 = pnand %p254_p6, %p248_p3 }
  0x11   :  { %258 = shalt.err (!%p255_p7)
}
  0x12   :  { %23 = dma.hbm_to_vmem [thread:$0]  %s381_s1, 256, %s21_s13, [#allocation4]  }
  0x13   :  { %s259_s28 = scalar_lea.hbm %s382_s2, 4096 }
  0x14   :  { %p260_p8 = scmp.ne.s32.totalorder %s382_s2, %s259_s28  ;;  %p263_p9 = scmp.lt.u32.totalorder %s259_s28, %s382_s2 }
  0x16   :  { %p265_p10 = pnand %p263_p9, %p260_p8 }
  0x18   :  { %268 = shalt.err (!%p265_p10)
}
  0x19   :  { %s269_s6 = scalar_lea.vmem %s334_s15, 4096  ;;  %p274_p12 = scmp.lt.s32.totalorder %s334_s15, %s334_s15 }
  0x1a   :  { %p270_p11 = scmp.ne.s32.totalorder %s334_s15, %s269_s6  ;;  %p275_p13 = scmp.lt.s32.totalorder %s269_s6, %s269_s6 }
  0x1c   :  { %p276_p0 = por %p275_p13, %p274_p12 }
  0x1e   :  { %p277_p1 = pnand %p276_p0, %p270_p11 }
  0x20   :  { %280 = shalt.err (!%p277_p1)
}
  0x21   :  { %s311_s1 = smov 128   ;;  %s312_s7 = smov 8  }
  0x22   :  { %35 = dma.hbm_to_vmem [thread:$0]  %s382_s2, 4096, %s334_s15, [#allocation7], %s311_s1, %s311_s1, %s312_s7  }
  0x23   :  { %303 = dma.done.wait [#allocation4], 256  }
  0x24   :  { %304 = vsyncadd [#allocation4], 4294967040 }
  0x25   :  { %305 = dma.done.wait [#allocation7], 4096  }
  0x26   :  { %306 = vsyncadd [#allocation7], 4294963200  ;;  %v60_v0 = vld [vmem:[#allocation6 + $0x80] sm:$0xff]  ;;  %v61_v1 = vld [vmem:[#allocation6 + $0x88] sm:$0xff]  ;;  %v77_v51 = vstv %s380_s0  ;;  %s313_s11 = smov [#allocation8]  }
  0x27   :  { %v44_v2 = vld [vmem:[#allocation6] sm:$0xff]  ;;  %v200_v3 = vpack.c.bf16 %v61_v1, %v60_v0  ;;  %v45_v4 = vld [vmem:[#allocation6 + $0x8] sm:$0xff]  ;;  %v62_v5 = vld [vmem:[#allocation6 + $0x90] sm:$0xff]  ;;  %s155_s12 = sshll.u32 %s313_s11, 4  ;;  %s156_s12 = int_to_ptr.vmem [resolvable:$true] %s155_s12 }
  0x28   :  { %v63_v6 = vld [vmem:[#allocation6 + $0x98] sm:$0xff]  ;;  %v202_v7 = vpack.c.bf16 %v45_v4, %v44_v2  ;;  %v46_v9 = vld [vmem:[#allocation6 + $0x10] sm:$0xff]  ;;  %v64_v11 = vld [vmem:[#allocation6 + $0xa0] sm:$0xff]  ;;  %s281_s13 = scalar_lea.vmem %s156_s12, 128  ;;  %p286_p3 = scmp.lt.s32.totalorder %s156_s12, %s156_s12 }
  0x29   :  { %v204_v8 = vpack.c.bf16 %v63_v6, %v62_v5  ;;  %v47_v10 = vld [vmem:[#allocation6 + $0x18] sm:$0xff]  ;;  %201 = vmatprep.subr.bf16.mxu0 %v200_v3  ;;  %v65_v12 = vld [vmem:[#allocation6 + $0xa8] sm:$0xff]  ;;  %v48_v15 = vld [vmem:[#allocation6 + $0x20] sm:$0xff]  ;;  %p282_p2 = scmp.ne.s32.totalorder %s156_s12, %s281_s13  ;;  %p287_p4 = scmp.lt.s32.totalorder %s281_s13, %s281_s13 }
  0x2a   :  { %203 = vmatpush3.bf16.msra.mxu0 %v202_v7  ;;  %v206_v13 = vpack.c.bf16 %v47_v10, %v46_v9  ;;  %v208_v14 = vpack.c.bf16 %v65_v12, %v64_v11  ;;  %v49_v16 = vld [vmem:[#allocation6 + $0x28] sm:$0xff]  ;;  %v66_v17 = vld [vmem:[#allocation6 + $0xb0] sm:$0xff]  ;;  %v67_v18 = vld [vmem:[#allocation6 + $0xb8] sm:$0xff] }
  0x2b   :  { %205 = vmatprep.subr.bf16.mxu0 %v204_v8  ;;  %v210_v19 = vpack.c.bf16 %v49_v16, %v48_v15  ;;  %v212_v20 = vpack.c.bf16 %v67_v18, %v66_v17  ;;  %v50_v21 = vld [vmem:[#allocation6 + $0x30] sm:$0xff]  ;;  %v51_v22 = vld [vmem:[#allocation6 + $0x38] sm:$0xff]  ;;  %v68_v23 = vld [vmem:[#allocation6 + $0xc0] sm:$0xff]  ;;  %p288_p5 = por %p287_p4, %p286_p3 }
  0x2c   :  { %v69_v24 = vld [vmem:[#allocation6 + $0xc8] sm:$0xff]  ;;  %v43_v25 = vld [vmem:[#allocation3 + $0x8] sm:$0xff]  ;;  %v214_v26 = vpack.c.bf16 %v51_v22, %v50_v21  ;;  %v52_v28 = vld [vmem:[#allocation6 + $0x40] sm:$0xff] }
  0x2d   :  { %142 = vmatprep.mubr.f32.mxu0 %v43_v25  ;;  %v216_v27 = vpack.c.bf16 %v69_v24, %v68_v23  ;;  %v53_v29 = vld [vmem:[#allocation6 + $0x48] sm:$0xff]  ;;  %v70_v30 = vld [vmem:[#allocation6 + $0xd0] sm:$0xff]  ;;  %v71_v31 = vld [vmem:[#allocation6 + $0xd8] sm:$0xff]  ;;  %p289_p6 = pnand %p288_p5, %p282_p2 }
  0x2e   :  { %207 = vmatpush3.bf16.msra.mxu0 %v206_v13  ;;  %v218_v32 = vpack.c.bf16 %v53_v29, %v52_v28  ;;  %v220_v33 = vpack.c.bf16 %v71_v31, %v70_v30  ;;  %v54_v34 = vld [vmem:[#allocation6 + $0x50] sm:$0xff]  ;;  %v55_v35 = vld [vmem:[#allocation6 + $0x58] sm:$0xff]  ;;  %v72_v36 = vld [vmem:[#allocation6 + $0xe0] sm:$0xff] }
  0x2f   :  { %209 = vmatprep.subr.bf16.mxu0 %v208_v14  ;;  %v73_v37 = vld [vmem:[#allocation6 + $0xe8] sm:$0xff]  ;;  %v222_v38 = vpack.c.bf16 %v55_v35, %v54_v34  ;;  %v56_v40 = vld [vmem:[#allocation6 + $0x60] sm:$0xff]  ;;  %v74_v42 = vld [vmem:[#allocation6 + $0xf0] sm:$0xff] }
  0x30   :  { %v224_v39 = vpack.c.bf16 %v73_v37, %v72_v36  ;;  %v57_v41 = vld [vmem:[#allocation6 + $0x68] sm:$0xff]  ;;  %v75_v43 = vld [vmem:[#allocation6 + $0xf8] sm:$0xff]  ;;  %v58_v46 = vld [vmem:[#allocation6 + $0x70] sm:$0xff] }
  0x31   :  { %v226_v44 = vpack.c.bf16 %v57_v41, %v56_v40  ;;  %v228_v45 = vpack.c.bf16 %v75_v43, %v74_v42  ;;  %v59_v47 = vld [vmem:[#allocation6 + $0x78] sm:$0xff]  ;;  %v42_v49 = vld [vmem:[#allocation3] sm:$0xff] }
  0x32   :  { %211 = vmatpush3.bf16.msra.mxu0 %v210_v19  ;;  %v230_v48 = vpack.c.bf16 %v59_v47, %v58_v46 }
  0x33   :  { %213 = vmatprep.subr.bf16.mxu0 %v212_v20 }
  0x36   :  { %215 = vmatpush3.bf16.msra.mxu0 %v214_v26 }
  0x37   :  { %217 = vmatprep.subr.bf16.mxu0 %v216_v27 }
  0x3a   :  { %219 = vmatpush3.bf16.msra.mxu0 %v218_v32 }
  0x3b   :  { %221 = vmatprep.subr.bf16.mxu0 %v220_v33 }
  0x3e   :  { %223 = vmatpush3.bf16.msra.mxu0 %v222_v38 }
  0x3f   :  { %225 = vmatprep.subr.bf16.mxu0 %v224_v39 }
  0x42   :  { %227 = vmatpush3.bf16.msra.mxu0 %v226_v44 }
  0x43   :  { %229 = vmatprep.subr.bf16.mxu0 %v228_v45 }
  0x46   :  { %231 = vmatpush3.bf16.msra.mxu0 %v230_v48 }
  0x49   :  { %143 = vmatmul.mubr.f32.vlgmr.msra.gmra.mrb[0].mxu0 %v42_v49 }
 0x11c   :  { %v197_v50 = vpop.f32.mrb[0].mxu0 }
 0x11d   :  { %v198_v52 = vpop.f32.mrb[1].mxu0 }
 0x11e   :  { %v199_v53 = vadd.f32 %v198_v52, %v197_v50 }
 0x120   :  { %v145_v54 = vadd.f32 %v199_v53, %v77_v51 }
 0x122   :  { %148 = vst [vmem:[#allocation8] sm:$0xff] %v145_v54 }
 0x123   :  { %292 = shalt.err (!%p289_p6)
}
 0x124   :  { %s293_s16 = scalar_lea.hbm %s383_s3, 128 }
 0x125   :  { %p294_p7 = scmp.ne.s32.totalorder %s383_s3, %s293_s16  ;;  %p297_p8 = scmp.lt.u32.totalorder %s293_s16, %s383_s3 }
 0x127   :  { %p299_p9 = pnand %p297_p8, %p294_p7 }
 0x129   :  { %302 = shalt.err (!%p299_p9)
}
 0x12a   :  { %158 = dma.vmem_to_hbm [thread:$0]  %s156_s12, 128, %s383_s3, [#allocation5]  }
 0x12b   :  { %307 = dma.done.wait [#allocation5], 128  }
 0x12c   :  { %308 = vsyncadd [#allocation5], 4294967168 }
 0x12d   :  { %162 = vsyncpa [#allocation4], 1 }
 0x12e   :  { %163 = vsyncpa [#allocation7], 1 }
 0x12f   :  { %164 = vsyncpa [#allocation5], 1 }

</bundles_post_ra>
